<compile_context>
chip_gen: v6e
topology: v6e:2x2x1
jax: 0.10.0
libtpu: 0.0.40
codegen_flags: <defaults>
</compile_context>

<pallas_src>
import functools

import jax
import jax.numpy as jnp
from jax import lax
from jax.experimental import pallas as pl
from jax.experimental.pallas import tpu as pltpu

KH = KW = 3
PAD = 1  # Conv2d(kernel_size=3, padding=1)


def afuse_kernel(w_ref, rgb_ref, t_ref, rgbt_ref, o_ref, fused_ref, stacked_ref,
                 *, pad_w, halo):
    # w_ref      : (C, 27C)      lane-dense tap-major weight slab (resident in VMEM)
    # rgb/t/rgbt : (1, C, GLW)   one batch group; spatial (H+2, W+2) flattened onto
    #                            lanes, G images concatenated, GLW = halo + GL + halo
    # o_ref      : (1, C, GL)    conv output on the padded-image lane layout
    # fused_ref  : (3C, GLW)     scratch: cat([t1, t2, rgbt]) in the MXU operand dtype
    # stacked_ref: (27C, GL)     scratch: the 9 shifted taps stacked along K
    C = rgb_ref.shape[1]
    GL = o_ref.shape[2]
    cdt = fused_ref.dtype

    rgb = rgb_ref[0]
    t = t_ref[0]
    rgbt = rgbt_ref[0]

    # Elementwise fusion on the VPU (input precision), cast once to the MXU
    # operand dtype, written channel-major so the conv sees one (3C, GLW) operand.
    fused_ref[0:C, :] = (rgb * rgbt + rgb).astype(cdt)        # tensor1
    fused_ref[C:2 * C, :] = (t * rgbt + rgbt).astype(cdt)     # tensor2
    fused_ref[2 * C:3 * C, :] = rgbt.astype(cdt)              # tensor3

    # 3x3 taps = static lane-offset windows of the fused block.  Zero padding and
    # the in-bounds margins are baked into the layout by the wrapper, so no border
    # masks are needed and every read is in bounds (margin lanes only ever feed
    # output positions that the wrapper crops away).
    for kh in range(KH):
        for kw in range(KW):
            k = kh * KW + kw
            start = halo + (kh - PAD) * pad_w + (kw - PAD)    # static, >= 0
            stacked_ref[k * 3 * C:(k + 1) * 3 * C, :] = fused_ref[:, start:start + GL]

    # Single fused channel contraction on the MXU: (C, 27C) @ (27C, GL), f32 acc.
    acc = jnp.dot(w_ref[...], stacked_ref[...], preferred_element_type=jnp.float32)
    o_ref[...] = acc[None].astype(o_ref.dtype)                # lane-dense store


def afuse(rgb, t, rgbt, conv_weight, *, compute_dtype=jnp.bfloat16):
    """rgb/t/rgbt: (N, C, H, W); conv_weight: (C, 3C, 3, 3) OIHW, bias-free."""
    N, C, H, W = rgb.shape
    assert conv_weight.shape == (C, 3 * C, KH, KW)
    Hp, Wp = H + 2 * PAD, W + 2 * PAD
    L = Hp * Wp                              # lanes per zero-padded image
    halo = 128 * pl.cdiv(Wp + PAD, 128)      # >= max tap offset (Wp+1), lane-aligned

    # Lane-dense, tap-major weight slab: w_slab[o, (kh*3+kw)*3C + c] = W[o, c, kh, kw].
    w_slab = jnp.transpose(conv_weight, (0, 2, 3, 1)).reshape(C, KH * KW * 3 * C)
    w_slab = w_slab.astype(compute_dtype)

    # Batch-group size: as many images per grid step as fit a conservative VMEM
    # budget (amortizes per-step overhead; the tiny test collapses to ONE step).
    budget = 12 * 1024 * 1024
    per_image = 128 * C * L                  # rough bytes/image: dbl-buffered IO + scratch
    G = max(1, min(N, budget // max(per_image, 1)))
    while N % G:
        G -= 1
    ng = N // G
    GL = G * L
    GLW = GL + 2 * halo

    def to_lanes(x):
        xp = jnp.pad(x, ((0, 0), (0, 0), (PAD, PAD), (PAD, PAD)))   # conv zero padding
        xp = xp.reshape(ng, G, C, L)
        xp = jnp.transpose(xp, (0, 2, 1, 3)).reshape(ng, C, GL)     # lane-concat group
        return jnp.pad(xp, ((0, 0), (0, 0), (halo, halo)))          # in-bounds margins

    rgb_l, t_l, rgbt_l = to_lanes(rgb), to_lanes(t), to_lanes(rgbt)

    kernel = functools.partial(afuse_kernel, pad_w=Wp, halo=halo)

    out = pl.pallas_call(
        kernel,
        out_shape=jax.ShapeDtypeStruct((ng, C, GL), rgb.dtype),
        grid=(ng,),
        in_specs=[
            pl.BlockSpec((C, KH * KW * 3 * C), lambda g: (0, 0)),   # weights, resident
            pl.BlockSpec((1, C, GLW), lambda g: (g, 0, 0)),         # rgb
            pl.BlockSpec((1, C, GLW), lambda g: (g, 0, 0)),         # t
            pl.BlockSpec((1, C, GLW), lambda g: (g, 0, 0)),         # rgbt
        ],
        out_specs=pl.BlockSpec((1, C, GL), lambda g: (g, 0, 0)),
        scratch_shapes=[
            pltpu.VMEM((3 * C, GLW), compute_dtype),                # fused
            pltpu.VMEM((KH * KW * 3 * C, GL), compute_dtype),       # stacked taps
        ],
        compiler_params=pltpu.CompilerParams(
            dimension_semantics=("parallel",)),
    )(w_slab, rgb_l, t_l, rgbt_l)

    # (ng, C, G*L) -> (N, C, Hp, Wp) -> crop the conv padding back off.
    out = out.reshape(ng, C, G, Hp, Wp)
    out = jnp.transpose(out, (0, 2, 1, 3, 4)).reshape(N, C, Hp, Wp)
    return out[:, :, PAD:PAD + H, PAD:PAD + W]


def afuse_ref(rgb, t, rgbt, conv_weight):
    # Pure-JAX reference mirroring the PyTorch forward (exact f32 conv).
    t1 = rgb * rgbt + rgb
    t2 = t * rgbt + rgbt
    cat = jnp.concatenate([t1, t2, rgbt], axis=1)
    return lax.conv_general_dilated(
        cat, conv_weight, window_strides=(1, 1),
        padding=[(PAD, PAD), (PAD, PAD)],
        dimension_numbers=("NCHW", "OIHW", "NCHW"),
        precision=lax.Precision.HIGHEST)


if __name__ == "__main__":
    key = jax.random.PRNGKey(0)
    k1, k2, k3, k4 = jax.random.split(key, 4)

    # Small shapes consistent with the module: N=2, in_channel=4, H=W=16.
    N, C, H, W = 2, 4, 16, 16
    rgb = jax.random.normal(k1, (N, C, H, W), dtype=jnp.float32)
    t = jax.random.normal(k2, (N, C, H, W), dtype=jnp.float32)
    rgbt = jax.random.normal(k3, (N, C, H, W), dtype=jnp.float32)
    # conv1 weight: (out=C, in=3C, 3, 3), bias=False.
    w = jax.random.normal(k4, (C, 3 * C, KH, KW), dtype=jnp.float32) * 0.1

    out = jax.block_until_ready(afuse(rgb, t, rgbt, w))
    ref = afuse_ref(rgb, t, rgbt, w)
    assert out.shape == ref.shape == (N, C, H, W)

    # Kernel contracts bf16 MXU operands with an f32 accumulator; vs. the exact
    # f32 reference the error is ~sqrt(K)*2^-8 scaled by the operands (<~1e-2 here).
    err = float(jnp.max(jnp.abs(out - ref)))
    assert jnp.allclose(out, ref, atol=3e-2, rtol=3e-2), err

    print("KERNEL_OK")
</pallas_src>

<mosaic_0001>
module attributes {stable_mosaic.version = 11 : i64} {
  func.func @afuse_kernel(%arg0: i32, %arg1: memref<4x108xbf16, #tpu.memory_space<vmem>>, %arg2: memref<1x4x904xf32, #tpu.memory_space<vmem>>, %arg3: memref<1x4x904xf32, #tpu.memory_space<vmem>>, %arg4: memref<1x4x904xf32, #tpu.memory_space<vmem>>, %arg5: memref<1x4x648xf32, #tpu.memory_space<vmem>>, %arg6: memref<12x904xbf16, #tpu.memory_space<vmem>>, %arg7: memref<108x648xbf16, #tpu.memory_space<vmem>>) attributes {dimension_semantics = [#tpu.dimension_semantics<parallel>], iteration_bounds = array<i64: 1>, scalar_prefetch = 0 : i64, scratch_operands = 2 : i64, tpu.core_type = #tpu.core_type<tc>, window_params = [{pipeline_mode = #tpu.pipeline_mode<synchronous>, transform_indices = @transform_0, window_bounds = array<i64: 4, 108>}, {transform_indices = @transform_1, window_bounds = array<i64: 1, 4, 904>}, {transform_indices = @transform_2, window_bounds = array<i64: 1, 4, 904>}, {transform_indices = @transform_3, window_bounds = array<i64: 1, 4, 904>}, {transform_indices = @transform_4, window_bounds = array<i64: 1, 4, 648>}]} {
    %c0 = arith.constant 0 : index
    %c0_0 = arith.constant 0 : index
    %c0_1 = arith.constant 0 : index
    %0 = vector.load %arg2[%c0, %c0_0, %c0_1] : memref<1x4x904xf32, #tpu.memory_space<vmem>>, vector<1x4x904xf32>
    %1 = vector.shape_cast %0 : vector<1x4x904xf32> to vector<4x904xf32>
    %c0_2 = arith.constant 0 : index
    %c0_3 = arith.constant 0 : index
    %c0_4 = arith.constant 0 : index
    %2 = vector.load %arg3[%c0_2, %c0_3, %c0_4] : memref<1x4x904xf32, #tpu.memory_space<vmem>>, vector<1x4x904xf32>
    %3 = vector.shape_cast %2 : vector<1x4x904xf32> to vector<4x904xf32>
    %c0_5 = arith.constant 0 : index
    %c0_6 = arith.constant 0 : index
    %c0_7 = arith.constant 0 : index
    %4 = vector.load %arg4[%c0_5, %c0_6, %c0_7] : memref<1x4x904xf32, #tpu.memory_space<vmem>>, vector<1x4x904xf32>
    %5 = vector.shape_cast %4 : vector<1x4x904xf32> to vector<4x904xf32>
    %6 = arith.mulf %1, %5 : vector<4x904xf32>
    %7 = arith.addf %6, %1 : vector<4x904xf32>
    %8 = arith.truncf %7 : vector<4x904xf32> to vector<4x904xbf16>
    %c0_8 = arith.constant 0 : index
    %c0_9 = arith.constant 0 : index
    %9 = vector.load %arg6[%c0_8, %c0_9] : memref<12x904xbf16, #tpu.memory_space<vmem>>, vector<4x904xbf16>
    tpu.vector_store %arg6[%c0_8, %c0_9], %8 {strides = array<i32>} : memref<12x904xbf16, #tpu.memory_space<vmem>>, vector<4x904xbf16>,
    %10 = arith.mulf %3, %5 : vector<4x904xf32>
    %11 = arith.addf %10, %5 : vector<4x904xf32>
    %12 = arith.truncf %11 : vector<4x904xf32> to vector<4x904xbf16>
    %c4 = arith.constant 4 : index
    %c0_10 = arith.constant 0 : index
    %13 = vector.load %arg6[%c4, %c0_10] : memref<12x904xbf16, #tpu.memory_space<vmem>>, vector<4x904xbf16>
    tpu.vector_store %arg6[%c4, %c0_10], %12 {strides = array<i32>} : memref<12x904xbf16, #tpu.memory_space<vmem>>, vector<4x904xbf16>,
    %14 = arith.truncf %5 : vector<4x904xf32> to vector<4x904xbf16>
    %c8 = arith.constant 8 : index
    %c0_11 = arith.constant 0 : index
    %15 = vector.load %arg6[%c8, %c0_11] : memref<12x904xbf16, #tpu.memory_space<vmem>>, vector<4x904xbf16>
    tpu.vector_store %arg6[%c8, %c0_11], %14 {strides = array<i32>} : memref<12x904xbf16, #tpu.memory_space<vmem>>, vector<4x904xbf16>,
    %c0_12 = arith.constant 0 : index
    %c109 = arith.constant 109 : index
    %16 = vector.load %arg6[%c0_12, %c109] : memref<12x904xbf16, #tpu.memory_space<vmem>>, vector<12x648xbf16>
    %c0_13 = arith.constant 0 : index
    %c0_14 = arith.constant 0 : index
    %17 = vector.load %arg7[%c0_13, %c0_14] : memref<108x648xbf16, #tpu.memory_space<vmem>>, vector<12x648xbf16>
    tpu.vector_store %arg7[%c0_13, %c0_14], %16 {strides = array<i32>} : memref<108x648xbf16, #tpu.memory_space<vmem>>, vector<12x648xbf16>,
    %c0_15 = arith.constant 0 : index
    %c110 = arith.constant 110 : index
    %18 = vector.load %arg6[%c0_15, %c110] : memref<12x904xbf16, #tpu.memory_space<vmem>>, vector<12x648xbf16>
    %c12 = arith.constant 12 : index
    %c0_16 = arith.constant 0 : index
    %19 = vector.load %arg7[%c12, %c0_16] : memref<108x648xbf16, #tpu.memory_space<vmem>>, vector<12x648xbf16>
    tpu.vector_store %arg7[%c12, %c0_16], %18 {strides = array<i32>} : memref<108x648xbf16, #tpu.memory_space<vmem>>, vector<12x648xbf16>,
    %c0_17 = arith.constant 0 : index
    %c111 = arith.constant 111 : index
    %20 = vector.load %arg6[%c0_17, %c111] : memref<12x904xbf16, #tpu.memory_space<vmem>>, vector<12x648xbf16>
    %c24 = arith.constant 24 : index
    %c0_18 = arith.constant 0 : index
    %21 = vector.load %arg7[%c24, %c0_18] : memref<108x648xbf16, #tpu.memory_space<vmem>>, vector<12x648xbf16>
    tpu.vector_store %arg7[%c24, %c0_18], %20 {strides = array<i32>} : memref<108x648xbf16, #tpu.memory_space<vmem>>, vector<12x648xbf16>,
    %c0_19 = arith.constant 0 : index
    %c127 = arith.constant 127 : index
    %22 = vector.load %arg6[%c0_19, %c127] : memref<12x904xbf16, #tpu.memory_space<vmem>>, vector<12x648xbf16>
    %c36 = arith.constant 36 : index
    %c0_20 = arith.constant 0 : index
    %23 = vector.load %arg7[%c36, %c0_20] : memref<108x648xbf16, #tpu.memory_space<vmem>>, vector<12x648xbf16>
    tpu.vector_store %arg7[%c36, %c0_20], %22 {strides = array<i32>} : memref<108x648xbf16, #tpu.memory_space<vmem>>, vector<12x648xbf16>,
    %c0_21 = arith.constant 0 : index
    %c128 = arith.constant 128 : index
    %24 = vector.load %arg6[%c0_21, %c128] : memref<12x904xbf16, #tpu.memory_space<vmem>>, vector<12x648xbf16>
    %c48 = arith.constant 48 : index
    %c0_22 = arith.constant 0 : index
    %25 = vector.load %arg7[%c48, %c0_22] : memref<108x648xbf16, #tpu.memory_space<vmem>>, vector<12x648xbf16>
    tpu.vector_store %arg7[%c48, %c0_22], %24 {strides = array<i32>} : memref<108x648xbf16, #tpu.memory_space<vmem>>, vector<12x648xbf16>,
    %c0_23 = arith.constant 0 : index
    %c129 = arith.constant 129 : index
    %26 = vector.load %arg6[%c0_23, %c129] : memref<12x904xbf16, #tpu.memory_space<vmem>>, vector<12x648xbf16>
    %c60 = arith.constant 60 : index
    %c0_24 = arith.constant 0 : index
    %27 = vector.load %arg7[%c60, %c0_24] : memref<108x648xbf16, #tpu.memory_space<vmem>>, vector<12x648xbf16>
    tpu.vector_store %arg7[%c60, %c0_24], %26 {strides = array<i32>} : memref<108x648xbf16, #tpu.memory_space<vmem>>, vector<12x648xbf16>,
    %c0_25 = arith.constant 0 : index
    %c145 = arith.constant 145 : index
    %28 = vector.load %arg6[%c0_25, %c145] : memref<12x904xbf16, #tpu.memory_space<vmem>>, vector<12x648xbf16>
    %c72 = arith.constant 72 : index
    %c0_26 = arith.constant 0 : index
    %29 = vector.load %arg7[%c72, %c0_26] : memref<108x648xbf16, #tpu.memory_space<vmem>>, vector<12x648xbf16>
    tpu.vector_store %arg7[%c72, %c0_26], %28 {strides = array<i32>} : memref<108x648xbf16, #tpu.memory_space<vmem>>, vector<12x648xbf16>,
    %c0_27 = arith.constant 0 : index
    %c146 = arith.constant 146 : index
    %30 = vector.load %arg6[%c0_27, %c146] : memref<12x904xbf16, #tpu.memory_space<vmem>>, vector<12x648xbf16>
    %c84 = arith.constant 84 : index
    %c0_28 = arith.constant 0 : index
    %31 = vector.load %arg7[%c84, %c0_28] : memref<108x648xbf16, #tpu.memory_space<vmem>>, vector<12x648xbf16>
    tpu.vector_store %arg7[%c84, %c0_28], %30 {strides = array<i32>} : memref<108x648xbf16, #tpu.memory_space<vmem>>, vector<12x648xbf16>,
    %c0_29 = arith.constant 0 : index
    %c147 = arith.constant 147 : index
    %32 = vector.load %arg6[%c0_29, %c147] : memref<12x904xbf16, #tpu.memory_space<vmem>>, vector<12x648xbf16>
    %c96 = arith.constant 96 : index
    %c0_30 = arith.constant 0 : index
    %33 = vector.load %arg7[%c96, %c0_30] : memref<108x648xbf16, #tpu.memory_space<vmem>>, vector<12x648xbf16>
    tpu.vector_store %arg7[%c96, %c0_30], %32 {strides = array<i32>} : memref<108x648xbf16, #tpu.memory_space<vmem>>, vector<12x648xbf16>,
    %c0_31 = arith.constant 0 : index
    %c0_32 = arith.constant 0 : index
    %34 = vector.load %arg1[%c0_31, %c0_32] : memref<4x108xbf16, #tpu.memory_space<vmem>>, vector<4x108xbf16>
    %c0_33 = arith.constant 0 : index
    %c0_34 = arith.constant 0 : index
    %35 = vector.load %arg7[%c0_33, %c0_34] : memref<108x648xbf16, #tpu.memory_space<vmem>>, vector<108x648xbf16>
    %cst = arith.constant dense<0.000000e+00> : vector<4x648xf32>
    %36 = tpu.matmul %34, %35, %cst {dimension_numbers = #tpu.dot_dimension_numbers<[1], [0], [0], [1], [0, 0, 1, 1], [], []>} : vector<4x108xbf16>, vector<108x648xbf16>, vector<4x648xf32> -> vector<4x648xf32>
    %37 = vector.shape_cast %36 : vector<4x648xf32> to vector<1x4x648xf32>
    %c0_35 = arith.constant 0 : index
    %c0_36 = arith.constant 0 : index
    %c0_37 = arith.constant 0 : index
    %38 = vector.load %arg5[%c0_35, %c0_36, %c0_37] : memref<1x4x648xf32, #tpu.memory_space<vmem>>, vector<1x4x648xf32>
    tpu.vector_store %arg5[%c0_35, %c0_36, %c0_37], %37 {strides = array<i32>} : memref<1x4x648xf32, #tpu.memory_space<vmem>>, vector<1x4x648xf32>,
    return
  }
  func.func @transform_0(%arg0: i32) -> (i32, i32) {
    %c0_i32 = arith.constant 0 : i32
    %c0_i32_0 = arith.constant 0 : i32
    %c0_i32_1 = arith.constant 0 : i32
    return %c0_i32, %c0_i32_0 : i32, i32
  }
  func.func @transform_1(%arg0: i32) -> (i32, i32, i32) {
    %c0_i32 = arith.constant 0 : i32
    %c0_i32_0 = arith.constant 0 : i32
    %c0_i32_1 = arith.constant 0 : i32
    return %arg0, %c0_i32, %c0_i32_0 : i32, i32, i32
  }
  func.func @transform_2(%arg0: i32) -> (i32, i32, i32) {
    %c0_i32 = arith.constant 0 : i32
    %c0_i32_0 = arith.constant 0 : i32
    %c0_i32_1 = arith.constant 0 : i32
    return %arg0, %c0_i32, %c0_i32_0 : i32, i32, i32
  }
  func.func @transform_3(%arg0: i32) -> (i32, i32, i32) {
    %c0_i32 = arith.constant 0 : i32
    %c0_i32_0 = arith.constant 0 : i32
    %c0_i32_1 = arith.constant 0 : i32
    return %arg0, %c0_i32, %c0_i32_0 : i32, i32, i32
  }
  func.func @transform_4(%arg0: i32) -> (i32, i32, i32) {
    %c0_i32 = arith.constant 0 : i32
    %c0_i32_0 = arith.constant 0 : i32
    %c0_i32_1 = arith.constant 0 : i32
    return %arg0, %c0_i32, %c0_i32_0 : i32, i32, i32
  }
}

</mosaic_0001>

<bundles_post_ra>
// kernel: tpu_custom_call.1
= control target key start
LH: loop header
LB: loop body
LE: loop exit
PB: predicated region body
PF: predicated region fallthrough
CT: control target
= control target key end

     0   :  { %9 = vsyncpa [#allocation5], 0  ;;  %s1842_s0 = inlined_call_operand.hbm [shape: bf16[4,108], index: 0, kind: input, shape index: {}]   ;;  %s1843_s1 = inlined_call_operand.hbm [shape: f32[1,4,904], index: 1, kind: input, shape index: {}]   ;;  %s1844_s2 = inlined_call_operand.hbm [shape: f32[1,4,904], index: 2, kind: input, shape index: {}]   ;;  %s1845_s3 = inlined_call_operand.hbm [shape: f32[1,4,904], index: 3, kind: input, shape index: {}]   ;;  %s1846_s4 = inlined_call_operand.hbm [shape: f32[1,4,648], index: 4, kind: output, shape index: {}]  }
   0x1   :  { %10 = vsyncpa [#allocation8], 0 }
   0x2   :  { %11 = vsyncpa [#allocation11], 0 }
   0x3   :  { %12 = vsyncpa [#allocation6], 0  ;;  %s1399_s15 = smov [#allocation7]   ;;  %s1400_s17 = smov [#allocation4]  }
   0x4   :  { %s29_s16 = sshll.u32 %s1399_s15, 4  ;;  %s19_s18 = sshll.u32 %s1400_s17, 4  ;;  %s30_s16 = int_to_ptr.vmem [resolvable:$true] %s29_s16  ;;  %s20_s18 = int_to_ptr.vmem [resolvable:$true] %s19_s18 }
   0x5   :  { %s1299_s19 = scalar_lea.vmem %s30_s16, 512  ;;  %p1304_p1 = scmp.lt.s32.totalorder %s30_s16, %s30_s16 }
   0x6   :  { %p1300_p0 = scmp.ne.s32.totalorder %s30_s16, %s1299_s19  ;;  %p1305_p2 = scmp.lt.s32.totalorder %s1299_s19, %s1299_s19 }
   0x8   :  { %p1306_p3 = por %p1305_p2, %p1304_p1 }
   0xa   :  { %p1307_p4 = pnand %p1306_p3, %p1300_p0 }
   0xc   :  { %1310 = shalt.err (!%p1307_p4)
}
   0xd   :  { %32 = dma.hbm_to_vmem [thread:$0]  %s1843_s1, 512, %s30_s16, [#allocation8]  }
   0xe   :  { %s1319_s22 = scalar_lea.vmem %s20_s18, 32  ;;  %p1324_p6 = scmp.lt.s32.totalorder %s20_s18, %s20_s18 }
   0xf   :  { %p1320_p5 = scmp.ne.s32.totalorder %s20_s18, %s1319_s22  ;;  %p1325_p7 = scmp.lt.s32.totalorder %s1319_s22, %s1319_s22 }
  0x11   :  { %p1326_p8 = por %p1325_p7, %p1324_p6 }
  0x13   :  { %p1327_p9 = pnand %p1326_p8, %p1320_p5 }
  0x15   :  { %1330 = shalt.err (!%p1327_p9)
}
  0x16   :  { %22 = dma.hbm_to_vmem [thread:$0]  %s1842_s0, 32, %s20_s18, [#allocation5]  }
  0x17   :  { %s1401_s25 = smov [#allocation9]   ;;  %s1402_s27 = smov [#allocation10]  }
  0x18   :  { %s39_s26 = sshll.u32 %s1401_s25, 4  ;;  %s49_s28 = sshll.u32 %s1402_s27, 4  ;;  %s40_s26 = int_to_ptr.vmem [resolvable:$true] %s39_s26  ;;  %s50_s28 = int_to_ptr.vmem [resolvable:$true] %s49_s28 }
  0x19   :  { %s1339_s29 = scalar_lea.vmem %s40_s26, 512  ;;  %p1344_p11 = scmp.lt.s32.totalorder %s40_s26, %s40_s26 }
  0x1a   :  { %p1340_p10 = scmp.ne.s32.totalorder %s40_s26, %s1339_s29  ;;  %p1345_p12 = scmp.lt.s32.totalorder %s1339_s29, %s1339_s29 }
  0x1c   :  { %p1346_p13 = por %p1345_p12, %p1344_p11 }
  0x1e   :  { %p1347_p0 = pnand %p1346_p13, %p1340_p10 }
  0x20   :  { %1350 = shalt.err (!%p1347_p0)
}
  0x21   :  { %42 = dma.hbm_to_vmem [thread:$0]  %s1844_s2, 512, %s40_s26, [#allocation8]  }
  0x22   :  { %s1359_s5 = scalar_lea.vmem %s50_s28, 512  ;;  %p1364_p2 = scmp.lt.s32.totalorder %s50_s28, %s50_s28 }
  0x23   :  { %p1360_p1 = scmp.ne.s32.totalorder %s50_s28, %s1359_s5  ;;  %p1365_p3 = scmp.lt.s32.totalorder %s1359_s5, %s1359_s5 }
  0x25   :  { %p1366_p4 = por %p1365_p3, %p1364_p2 }
  0x27   :  { %p1367_p5 = pnand %p1366_p4, %p1360_p1 }
  0x29   :  { %1370 = shalt.err (!%p1367_p5)
}
  0x2a   :  { %52 = dma.hbm_to_vmem [thread:$0]  %s1845_s3, 512, %s50_s28, [#allocation11]  }
  0x2b   :  { %1391 = dma.done.wait [#allocation5], 32  }
  0x2c   :  { %1392 = vsyncadd [#allocation5], 4294967264 }
  0x2d   :  { %1393 = dma.done.wait [#allocation8], 1024  }
  0x2e   :  { %1394 = vsyncadd [#allocation8], 4294966272 }
  0x2f   :  { %1395 = dma.done.wait [#allocation11], 512  }
  0x30   :  { %1396 = vsyncadd [#allocation11], 4294966784  ;;  %v74_v0 = vld [vmem:[#allocation10] sm:$0xff]  ;;  %v75_v1 = vld [vmem:[#allocation10 + $0x8] sm:$0xff]  ;;  %vm133_vm0 = vcmask 1041408   ;;  %vm134_vm1 = vcmask 62468  }
  0x31   :  { %v76_v2 = vld [vmem:[#allocation10 + $0x10] sm:$0xff]  ;;  %v204_v3 = vcombine.high %v74_v0, %v74_v0  ;;  %v205_v4 = vcombine.high %v75_v1, %v75_v1  ;;  %v66_v6 = vld [vmem:[#allocation7] sm:$0xff]  ;;  %v67_v7 = vld [vmem:[#allocation7 + $0x8] sm:$0xff]  ;;  %s1403_s2 = smov 109   ;;  %s1404_s3 = smov 111   ;;  %vm196_vm3 = vcmask 1043458  }
  0x32   :  { %v206_v5 = vcombine.high %v76_v2, %v76_v2  ;;  %v70_v8 = vld [vmem:[#allocation9] sm:$0xff]  ;;  %v71_v9 = vld [vmem:[#allocation9 + $0x8] sm:$0xff]  ;;  %v78_v10 = vmul.f32 %v74_v0, %v66_v6  ;;  %v79_v11 = vmul.f32 %v75_v1, %v67_v7  ;;  %v68_v13 = vld [vmem:[#allocation7 + $0x10] sm:$0xff]  ;;  %vm197_vm4 = vcmask 64518   ;;  %s1405_s7 = smov 110   ;;  %s1406_s8 = smov 127  }
  0x33   :  { %v137_v12 = vmul.f32 %v74_v0, %v70_v8  ;;  %v72_v14 = vld [vmem:[#allocation9 + $0x10] sm:$0xff]  ;;  %v1248_v15 = vpack.c.bf16 %v204_v3, %v74_v0  ;;  %v1249_v16 = vpack.c.bf16 %v205_v4, %v75_v1  ;;  %v138_v18 = vmul.f32 %v75_v1, %v71_v9  ;;  %v69_v19 = vld [vmem:[#allocation7 + $0x18] sm:$0xff]  ;;  %vm1452_vm2 = vmor %vm134_vm1, %vm133_vm0  ;;  %s1407_s9 = smov 17   ;;  %s1408_s10 = smov 1  }
  0x34   :  { %v1250_v17 = vpack.c.bf16 %v206_v5, %v76_v2  ;;  %v82_v20 = vadd.f32 %v78_v10, %v66_v6  ;;  %v83_v21 = vadd.f32 %v79_v11, %v67_v7  ;;  %v80_v23 = vmul.f32 %v76_v2, %v68_v13  ;;  %v77_v24 = vld [vmem:[#allocation10 + $0x18] sm:$0xff]  ;;  %vm1462_vm5 = vmor %vm197_vm4, %vm196_vm3  ;;  %s1409_s11 = smov 18   ;;  %s1410_s12 = smov 19  }
  0x35   :  { %v141_v22 = vadd.f32 %v137_v12, %v74_v0  ;;  %244 = vst [vmem:[#allocation2 + $0x20] sm:$0x33] %v1248_v15  ;;  %245 = vst [vmem:[#allocation2 + $0x28] sm:$0x33] %v1249_v16  ;;  %v142_v25 = vadd.f32 %v138_v18, %v75_v1  ;;  %v139_v26 = vmul.f32 %v76_v2, %v72_v14  ;;  %v73_v34 = vld [vmem:[#allocation9 + $0x18] sm:$0xff]  ;;  %vm318_vm6 = vcmask 1045508  }
  0x36   :  { %246 = vst [vmem:[#allocation2 + $0x30] sm:$0x33] %v1250_v17  ;;  %v207_v27 = vcombine.high %v77_v24, %v77_v24  ;;  %v81_v28 = vmul.f32 %v77_v24, %v69_v19  ;;  %v90_v29 = vcombine.high %v82_v20, %v82_v20  ;;  %v91_v30 = vcombine.high %v83_v21, %v83_v21  ;;  %vm1486_vm7 = vmor %vm133_vm0, %vm318_vm6  ;;  %s1412_s13 = smov [#allocation12]  }
  0x37   :  { %v149_v31 = vcombine.high %v141_v22, %v141_v22  ;;  %v84_v32 = vadd.f32 %v80_v23, %v68_v13  ;;  %v150_v35 = vcombine.high %v142_v25, %v142_v25  ;;  %v143_v36 = vadd.f32 %v139_v26, %v76_v2  ;;  %s1169_s14 = sshll.u32 %s1412_s13, 4  ;;  %s1170_s14 = int_to_ptr.vmem [resolvable:$true] %s1169_s14 }
  0x38   :  { %v1251_v37 = vpack.c.bf16 %v207_v27, %v77_v24  ;;  %v85_v38 = vadd.f32 %v81_v28, %v69_v19  ;;  %v1240_v39 = vpack.c.bf16 %v90_v29, %v82_v20  ;;  %v1241_v40 = vpack.c.bf16 %v91_v30, %v83_v21  ;;  %s1371_s15 = scalar_lea.vmem %s1170_s14, 384  ;;  %p1376_p7 = scmp.lt.s32.totalorder %s1170_s14, %s1170_s14 }
  0x39   :  { %v1244_v41 = vpack.c.bf16 %v149_v31, %v141_v22  ;;  %v92_v42 = vcombine.high %v84_v32, %v84_v32  ;;  %v1245_v43 = vpack.c.bf16 %v150_v35, %v142_v25  ;;  %v151_v44 = vcombine.high %v143_v36, %v143_v36  ;;  %p1372_p6 = scmp.ne.s32.totalorder %s1170_s14, %s1371_s15  ;;  %p1377_p8 = scmp.lt.s32.totalorder %s1371_s15, %s1371_s15 }
  0x3a   :  { %247 = vst.msk [vmem:[#allocation2 + $0x38] sm:$0x33] %vm1452_vm2, %v1251_v37  ;;  %v93_v45 = vcombine.high %v85_v38, %v85_v38  ;;  %v140_v46 = vmul.f32 %v77_v24, %v73_v34  ;;  %130 = vst [vmem:[#allocation2] sm:$0x33] %v1240_v39  ;;  %vm278_vm8 = vcmask 1043456   ;;  %vm299_vm9 = vcmask 64516  }
  0x3b   :  { %131 = vst [vmem:[#allocation2 + $0x8] sm:$0x33] %v1241_v40  ;;  %v185_v47 = vrot.slane %v1244_v41, 6  ;;  %v1242_v48 = vpack.c.bf16 %v92_v42, %v84_v32  ;;  %v186_v49 = vrot.slane %v1245_v43, 6  ;;  %v1246_v50 = vpack.c.bf16 %v151_v44, %v143_v36  ;;  %vm1527_vm10 = vmor %vm299_vm9, %vm278_vm8  ;;  %p1378_p9 = por %p1377_p8, %p1376_p7 }
  0x3c   :  { %v1243_v51 = vpack.c.bf16 %v93_v45, %v85_v38  ;;  %v144_v52 = vadd.f32 %v140_v46, %v77_v24  ;;  %v705_v53 = vld [vmem:[#allocation2 + $0x24] sm:$0x33]  ;;  %vm733_vm11 = vcmask 891904   ;;  %vm615_vm12 = vcmask 908288  }
  0x3d   :  { %v587_v54 = vld [vmem:[#allocation2 + $0x24] sm:$0x33]  ;;  %193 = vst [vmem:[#allocation2] sm:$0xcc] %v185_v47  ;;  %132 = vst [vmem:[#allocation2 + $0x10] sm:$0x33] %v1242_v48  ;;  %720 = vrot.lane.b32.xlu1 %v705_v53, %s1403_s2  ;;  %p1379_p10 = pnand %p1378_p9, %p1372_p6 }
  0x3e   :  { %602 = vrot.lane.b32.xlu0 %v587_v54, %s1404_s3  ;;  %194 = vst [vmem:[#allocation2 + $0x8] sm:$0xcc] %v186_v49  ;;  %v187_v55 = vrot.slane %v1246_v50, 6  ;;  %136 = vst.msk [vmem:[#allocation2 + $0x18] sm:$0x33] %vm1452_vm2, %v1243_v51  ;;  %v152_v56 = vcombine.high %v144_v52, %v144_v52  ;;  %vm1006_vm13 = vcmask 1045504  }
  0x3f   :  { %v706_v57 = vld [vmem:[#allocation2 + $0x2c] sm:$0x33]  ;;  %v510_v2 = vld [vmem:[#allocation2 + $0x24] sm:$0x33]  ;;  %vm680_vm14 = vcmask 900096   ;;  %vm562_vm15 = vcmask 1039360  }
  0x40   :  { %195 = vst [vmem:[#allocation2 + $0x10] sm:$0xcc] %v187_v55  ;;  %v1247_v58 = vpack.c.bf16 %v152_v56, %v144_v52  ;;  %v588_v61 = vld [vmem:[#allocation2 + $0x2c] sm:$0x33]  ;;  %516 = vst [vmem:[#allocation3 + $0xa8] sm:$0x33] %v510_v2 }
  0x41   :  { %722 = vrot.lane.b32.xlu1 %v706_v57, %s1403_s2  ;;  %v641_v1 = vld [vmem:[#allocation2 + $0x2c] sm:$0x33]  ;;  %v640_v7 = vld [vmem:[#allocation2 + $0x24] sm:$0x33]  ;;  %v707_v43 = vld [vmem:[#allocation2 + $0x34] sm:$0x33] }
  0x42   :  { %v188_v60 = vrot.slane %v1247_v58, 6  ;;  %v656_v5 = vrot.slane %v641_v1, 6  ;;  %v523_v8 = vld [vmem:[#allocation2 + $0x2c] sm:$0x33]  ;;  %v653_v11 = vrot.slane %v640_v7, 6  ;;  %v1411_v55 = vmov 0  }
  0x43   :  { %v538_v12 = vrot.slane %v523_v8, 6  ;;  %v522_v13 = vld [vmem:[#allocation2 + $0x24] sm:$0x33]  ;;  %v524_v45 = vld [vmem:[#allocation2 + $0x34] sm:$0x33]  ;;  %1057 = vmatprep.mubr.bf16.mxu0 %v1411_v55  ;;  %1098 = vmatprep.mubr.bf16.mxu1 %v1411_v55  ;;  %vm404_vm0 = vcmask 138240  }
  0x44   :  { %199 = vst.msk [vmem:[#allocation2 + $0x18] sm:$0xcc] %vm1462_vm5, %v188_v60  ;;  %v535_v16 = vrot.slane %v522_v13, 6  ;;  %v377_v19 = vld [vmem:[#allocation2 + $0x28] sm:$0x33]  ;;  %v426_v21 = vld [vmem:[#allocation2] sm:$0xff] }
  0x45   :  { %v1469_v62 = vld [vmem:[#allocation2 + $0x4] sm:$0xff]  ;;  %604 = vrot.lane.b32.xlu1 %v588_v61, %s1404_s3  ;;  %v442_v25 = vrot.slane %v426_v21, 6  ;;  %v541_v47 = vrot.slane %v524_v45, 6  ;;  %v642_v48 = vld [vmem:[#allocation2 + $0x34] sm:$0x33]  ;;  %vm483_vm1 = vcmask 7168  }
  0x46   :  { %714 = vrot.lane.b32.xlu0 %v1469_v62, %s1403_s2  ;;  %v649_v3 = vrot.slane %v1469_v62, 6  ;;  %v427_v17 = vld [vmem:[#allocation2 + $0x8] sm:$0xff]  ;;  %v376_v23 = vld [vmem:[#allocation2 + $0x20] sm:$0x33]  ;;  %v512_v49 = vld [vmem:[#allocation2 + $0x34] sm:$0x33] }
  0x47   :  { %v1474_v63 = vld [vmem:[#allocation2 + $0xc] sm:$0xff]  ;;  %v443_v20 = vrot.slane %v427_v17, 6  ;;  %v430_v27 = vld [vmem:[#allocation2 + $0x20] sm:$0x33]  ;;  %v446_v29 = vrot.slane %v442_v25, 4  ;;  %v659_v52 = vrot.slane %v642_v48, 6 }
  0x48   :  { %v650_v0 = vrot.slane %v1474_v63, 6  ;;  %v652_v9 = vrot.slane %v649_v3, 4  ;;  %v431_v22 = vld [vmem:[#allocation2 + $0x28] sm:$0x33]  ;;  %v447_v31 = vrot.slane %v430_v27, 6  ;;  %v428_v54 = vld [vmem:[#allocation2 + $0x10] sm:$0xff] }
  0x49   :  { %598 = vrot.lane.b32.xlu1 %v1474_v63, %s1404_s3  ;;  %v449_v24 = vrot.slane %v443_v20, 4  ;;  %v450_v26 = vrot.slane %v431_v22, 6  ;;  %v309_v28 = vld [vmem:[#allocation2 + $0x28] sm:$0x33]  ;;  %v308_v34 = vld [vmem:[#allocation2 + $0x20] sm:$0x33] }
  0x4a   :  { %716 = vrot.lane.b32.xlu0 %v1474_v63, %s1403_s2  ;;  %v655_v4 = vrot.slane %v650_v0, 4  ;;  %v654_v14 = vsel %vm1486_vm7, %v652_v9, %v653_v11  ;;  %v536_v18 = vsel %vm1486_vm7, %v652_v9, %v535_v16  ;;  %v327_v32 = vrot.slane %v309_v28, 6  ;;  %v252_v39 = vld [vmem:[#allocation2 + $0x28] sm:$0x33]  ;;  %v251_v42 = vld [vmem:[#allocation2 + $0x20] sm:$0x33] }
  0x4b   :  { %v451_v30 = vsel %vm1486_vm7, %v449_v24, %v450_v26  ;;  %v448_v35 = vsel %vm1486_vm7, %v446_v29, %v447_v31  ;;  %v324_v37 = vrot.slane %v308_v34, 6  ;;  %v704_v40 = vld [vmem:[#allocation2 + $0x14] sm:$0xff]  ;;  %518 = vst.msk [vmem:[#allocation3 + $0xb8] sm:$0x33] %vm1452_vm2, %v512_v49  ;;  %v511_v53 = vld [vmem:[#allocation2 + $0x2c] sm:$0x33] }
  0x4c   :  { %v657_v10 = vsel %vm1486_vm7, %v655_v4, %v656_v5  ;;  %v539_v15 = vsel %vm1486_vm7, %v655_v4, %v538_v12  ;;  %v328_v36 = vsel %vm1486_vm7, %v449_v24, %v327_v32  ;;  %515 = vst.msk [vmem:[#allocation3 + $0xa0] sm:$0xff] %vm1527_vm10, %v704_v40  ;;  %v651_v44 = vrot.slane %v704_v40, 6  ;;  %v589_v50 = vld [vmem:[#allocation2 + $0x34] sm:$0x33]  ;;  %517 = vst [vmem:[#allocation3 + $0xb0] sm:$0x33] %v511_v53 }
  0x4d   :  { %663 = vrot.lane.b32.xlu1 %v650_v0, %s1405_s7  ;;  %v325_v38 = vsel %vm1486_vm7, %v446_v29, %v324_v37  ;;  %v444_v57 = vrot.slane %v428_v54, 6  ;;  %v432_v58 = vld [vmem:[#allocation2 + $0x30] sm:$0x33]  ;;  %v433_v7 = vld [vmem:[#allocation2 + $0x38] sm:$0x3]  ;;  %vm351_vm3 = vcmask 146432  }
  0x4e   :  { %596 = vrot.lane.b32.xlu0 %v1469_v62, %s1404_s3  ;;  %v658_v46 = vrot.slane %v651_v44, 4  ;;  %v453_v61 = vrot.slane %v432_v58, 6  ;;  %v310_v1 = vld [vmem:[#allocation2 + $0x30] sm:$0x33]  ;;  %vm280_vm4 = vcmask 154624   ;;  %vm1002_vm6 = vcmask 883712  }
  0x4f   :  { %v452_v60 = vrot.slane %v444_v57, 4  ;;  %v378_v2 = vld [vmem:[#allocation2 + $0x30] sm:$0x33]  ;;  %v330_v5 = vrot.slane %v310_v1, 6 }
  0x50   :  { %v542_v51 = vsel %vm1486_vm7, %v658_v46, %v541_v47  ;;  %v660_v56 = vsel %vm1486_vm7, %v658_v46, %v659_v52  ;;  %v253_v12 = vld [vmem:[#allocation2 + $0x30] sm:$0x33] }
  0x51   :  { %545 = vrot.lane.b32.xlu1 %v650_v0, %s1406_s8  ;;  %v429_v0 = vld [vmem:[#allocation2 + $0x18] sm:$0xf]  ;;  %v331_v9 = vsel %vm1486_vm7, %v452_v60, %v330_v5 }
  0x52   :  { %661 = vrot.lane.b32.xlu0 %v649_v3, %s1405_s7  ;;  %v445_v4 = vrot.slane %v429_v0, 6 }
  0x54   :  { %v455_v8 = vrot.slane %v445_v4, 4 }
  0x55   :  { %669 = vrot.lane.b32.xlu1 %v657_v10, %s1405_s7  ;;  %v456_v10 = vrot.slane %v433_v7, 6 }
  0x56   :  { %543 = vrot.lane.b32.xlu0 %v649_v3, %s1406_s8  ;;  %v454_v3 = vsel %vm1486_vm7, %v452_v60, %v453_v61 }
  0x57   :  { %v457_v11 = vsel %vm1486_vm7, %v455_v8, %v456_v10 }
  0x59   :  { %551 = vrot.lane.b32.xlu1 %v539_v15, %s1406_s8 }
  0x5a   :  { %667 = vrot.lane.b32.xlu0 %v654_v14, %s1405_s7 }
  0x5d   :  { %393 = vrot.lane.b32.xlu1 %v377_v19, %s1407_s9 }
  0x5e   :  { %549 = vrot.lane.b32.xlu0 %v536_v18, %s1406_s8 }
  0x61   :  { %460 = vrot.lane.b32.xlu1 %v443_v20, %s1408_s10 }
  0x62   :  { %391 = vrot.lane.b32.xlu0 %v376_v23, %s1407_s9 }
  0x65   :  { %468 = vrot.lane.b32.xlu1 %v451_v30, %s1408_s10 }
  0x66   :  { %458 = vrot.lane.b32.xlu0 %v442_v25, %s1408_s10 }
  0x69   :  { %340 = vrot.lane.b32.xlu1 %v328_v36, %s1409_s11 }
  0x6a   :  { %466 = vrot.lane.b32.xlu0 %v448_v35, %s1408_s10 }
  0x6d   :  { %387 = vrot.lane.b32.xlu1 %v427_v17, %s1407_s9 }
  0x6e   :  { %338 = vrot.lane.b32.xlu0 %v325_v38, %s1409_s11 }
  0x71   :  { %262 = vrot.lane.b32.xlu1 %v427_v17, %s1410_s12 }
  0x72   :  { %385 = vrot.lane.b32.xlu0 %v426_v21, %s1407_s9 }
  0x75   :  { %268 = vrot.lane.b32.xlu1 %v252_v39, %s1410_s12 }
  0x76   :  { %260 = vrot.lane.b32.xlu0 %v426_v21, %s1410_s12 }
  0x79   :  { %334 = vrot.lane.b32.xlu1 %v443_v20, %s1409_s11 }
  0x7a   :  { %266 = vrot.lane.b32.xlu0 %v251_v42, %s1410_s12 }
  0x7d   :  { %724 = vrot.lane.b32.xlu1 %v707_v43, %s1403_s2 }
  0x7e   :  { %332 = vrot.lane.b32.xlu0 %v442_v25, %s1409_s11 }
  0x81   :  { %665 = vrot.lane.b32.xlu1 %v651_v44, %s1405_s7 }
  0x82   :  { %718 = vrot.lane.b32.xlu0 %v704_v40, %s1403_s2 }
  0x85   :  { %553 = vrot.lane.b32.xlu1 %v542_v51, %s1406_s8 }
  0x86   :  { %606 = vrot.lane.b32.xlu0 %v589_v50, %s1404_s3 }
  0x89   :  { %547 = vrot.lane.b32.xlu1 %v651_v44, %s1406_s8 }
  0x8a   :  { %671 = vrot.lane.b32.xlu0 %v660_v56, %s1405_s7 }
  0x8d   :  { %462 = vrot.lane.b32.xlu1 %v444_v57, %s1408_s10 }
  0x8e   :  { %600 = vrot.lane.b32.xlu0 %v704_v40, %s1404_s3 }
  0x91   :  { %470 = vrot.lane.b32.xlu1 %v454_v3, %s1408_s10 }
  0x92   :  { %395 = vrot.lane.b32.xlu0 %v378_v2, %s1407_s9 }
  0x95   :  { %342 = vrot.lane.b32.xlu1 %v331_v9, %s1409_s11 }
  0x96   :  { %464 = vrot.lane.b32.xlu0 %v445_v4, %s1408_s10 }
  0x99   :  { %264 = vrot.lane.b32.xlu1 %v428_v54, %s1410_s12 }
  0x9a   :  { %472 = vrot.lane.b32.xlu0 %v457_v11, %s1408_s10 }
  0x9d   :  { %336 = vrot.lane.b32.xlu1 %v444_v57, %s1409_s11 }
  0x9e   :  { %389 = vrot.lane.b32.xlu0 %v428_v54, %s1407_s9 }
  0xa2   :  { %270 = vrot.lane.b32.xlu0 %v253_v12, %s1410_s12 }
  0xaf   :  { %v721_v13 = vpop.permute.xlu1 %720 }
  0xb0   :  { %v603_v14 = vpop.permute.xlu0 %602  ;;  %v729_v16 = vrot.slane %v721_v13, 4 }
  0xb1   :  { %v611_v21 = vrot.slane %v603_v14, 4 }
  0xb3   :  { %v1568_v15 = vpop.permute.xlu1 %722 }
  0xb4   :  { %v730_v6 = vrot.slane %v1568_v15, 4 }
  0xb6   :  { %v738_v17 = vsel %vm278_vm8, %v729_v16, %v730_v6 }
  0xb7   :  { %v739_v18 = vsel %vm733_vm11, %v721_v13, %v738_v17  ;;  %v1575_v20 = vpop.permute.xlu1 %604 }
  0xb8   :  { %v715_v19 = vpop.permute.xlu0 %714  ;;  %752 = vst [vmem:[#allocation3 + $0x138] sm:$0x33] %v739_v18  ;;  %v612_v22 = vrot.slane %v1575_v20, 4 }
  0xb9   :  { %v726_v27 = vrot.slane %v715_v19, 4 }
  0xba   :  { %v620_v23 = vsel %vm278_vm8, %v611_v21, %v612_v22 }
  0xbb   :  { %v621_v24 = vsel %vm615_vm12, %v603_v14, %v620_v23  ;;  %v1584_v26 = vpop.permute.xlu1 %598 }
  0xbc   :  { %v1582_v25 = vpop.permute.xlu0 %716  ;;  %634 = vst [vmem:[#allocation3 + $0xf0] sm:$0x33] %v621_v24  ;;  %v609_v30 = vrot.slane %v1584_v26, 4 }
  0xbd   :  { %v727_v28 = vrot.slane %v1582_v25, 4 }
  0xbf   :  { %v732_v29 = vsel %vm278_vm8, %v726_v27, %v727_v28  ;;  %v1592_v34 = vpop.permute.xlu1 %663  ;;  %v795_v35 = vld [vmem:[#allocation3 + $0x138] sm:$0x33] }
  0xc0   :  { %v734_v31 = vsel %vm733_vm11, %v715_v19, %v732_v29  ;;  %v597_v32 = vpop.permute.xlu0 %596  ;;  %v674_v40 = vrot.slane %v1592_v34, 4 }
  0xc1   :  { %v608_v36 = vrot.slane %v597_v32, 4  ;;  %v1229_v37 = vcombine.high %v734_v31, %v795_v35  ;;  %v1228_v38 = vcombine.low %v734_v31, %v795_v35 }
  0xc3   :  { %v614_v39 = vsel %vm278_vm8, %v608_v36, %v609_v30  ;;  %1234 = vmatprep.subr.msk.bf16.mxu0 %vm1006_vm13, %v1229_v37  ;;  %v1008_v42 = vsel %vm1006_vm13, %v1228_v38, 0  ;;  %v1601_v45 = vpop.permute.xlu1 %545 }
  0xc4   :  { %v616_v43 = vsel %vm615_vm12, %v597_v32, %v614_v39  ;;  %v662_v44 = vpop.permute.xlu0 %661  ;;  %1028 = vmatpush1.bf16.msra.mxu0 %v1008_v42  ;;  %v556_v48 = vrot.slane %v1601_v45, 4 }
  0xc5   :  { %v673_v46 = vrot.slane %v662_v44, 4 }
  0xc7   :  { %v679_v47 = vsel %vm278_vm8, %v673_v46, %v674_v40  ;;  %v1608_v51 = vpop.permute.xlu1 %669 }
  0xc8   :  { %v681_v49 = vsel %vm680_vm14, %v662_v44, %v679_v47  ;;  %v544_v50 = vpop.permute.xlu0 %543  ;;  %v677_v54 = vrot.slane %v1608_v51, 4 }
  0xc9   :  { %696 = vst [vmem:[#allocation3 + $0xf0] sm:$0xcc] %v681_v49  ;;  %v555_v52 = vrot.slane %v544_v50, 4 }
  0xcb   :  { %v561_v53 = vsel %vm278_vm8, %v555_v52, %v556_v48  ;;  %v1615_v58 = vpop.permute.xlu1 %551 }
  0xcc   :  { %v563_v56 = vsel %vm562_vm15, %v544_v50, %v561_v53  ;;  %v668_v57 = vpop.permute.xlu0 %667  ;;  %v559_v0 = vrot.slane %v1615_v58, 4 }
  0xcd   :  { %578 = vst [vmem:[#allocation3 + $0xa8] sm:$0xcc] %v563_v56  ;;  %v676_v60 = vrot.slane %v668_v57, 4 }
  0xcf   :  { %v685_v61 = vsel %vm278_vm8, %v676_v60, %v677_v54  ;;  %v1622_v3 = vpop.permute.xlu1 %393 }
  0xd0   :  { %v686_v1 = vsel %vm680_vm14, %v668_v57, %v685_v61  ;;  %v550_v2 = vpop.permute.xlu0 %549  ;;  %v786_v4 = vld [vmem:[#allocation3 + $0xf0] sm:$0xff]  ;;  %v401_v10 = vrot.slane %v1622_v3, 4 }
  0xd1   :  { %v558_v5 = vrot.slane %v550_v2, 4  ;;  %v1223_v7 = vcombine.high %v786_v4, %v686_v1  ;;  %v1222_v8 = vcombine.low %v786_v4, %v686_v1 }
  0xd3   :  { %v567_v9 = vsel %vm278_vm8, %v558_v5, %v559_v0  ;;  %1029 = vmatprep.subr.bf16.mxu0 %v1223_v7  ;;  %v1629_v13 = vpop.permute.xlu1 %460 }
  0xd4   :  { %v568_v11 = vsel %vm562_vm15, %v550_v2, %v567_v9  ;;  %v392_v12 = vpop.permute.xlu0 %391  ;;  %1030 = vmatpush1.bf16.msra.mxu0 %v1222_v8  ;;  %v777_v14 = vld [vmem:[#allocation3 + $0xa8] sm:$0xff]  ;;  %v475_v21 = vrot.slane %v1629_v13, 4 }
  0xd5   :  { %v400_v16 = vrot.slane %v392_v12, 4  ;;  %v1217_v17 = vcombine.high %v568_v11, %v616_v43  ;;  %v1216_v18 = vcombine.low %v568_v11, %v616_v43  ;;  %v1211_v23 = vcombine.high %v1469_v62, %v777_v14 }
  0xd6   :  { %v1210_v32 = vcombine.low %v1469_v62, %v777_v14 }
  0xd7   :  { %v409_v19 = vsel %vm278_vm8, %v400_v16, %v401_v10  ;;  %1031 = vmatprep.subr.bf16.mxu0 %v1217_v17  ;;  %v1637_v29 = vpop.permute.xlu1 %468 }
  0xd8   :  { %v410_v24 = vsel %vm404_vm0, %v392_v12, %v409_v19  ;;  %v459_v27 = vpop.permute.xlu0 %458  ;;  %1032 = vmatpush1.bf16.msra.mxu0 %v1216_v18  ;;  %v479_v36 = vrot.slane %v1637_v29, 4 }
  0xd9   :  { %423 = vst [vmem:[#allocation3 + $0x60] sm:$0x33] %v410_v24  ;;  %v474_v31 = vrot.slane %v459_v27, 4  ;;  %1033 = vmatprep.subr.bf16.mxu0 %v1211_v23 }
  0xdb   :  { %v482_v35 = vsel %vm278_vm8, %v474_v31, %v475_v21  ;;  %v1645_v39 = vpop.permute.xlu1 %340 }
  0xdc   :  { %v484_v37 = vsel %vm483_vm1, %v459_v27, %v482_v35  ;;  %v467_v38 = vpop.permute.xlu0 %466  ;;  %1034 = vmatpush1.bf16.msra.mxu0 %v1210_v32  ;;  %v348_v62 = vrot.slane %v1645_v39, 4 }
  0xdd   :  { %501 = vst [vmem:[#allocation3 + $0x60] sm:$0xcc] %v484_v37  ;;  %v478_v42 = vrot.slane %v467_v38, 4 }
  0xdf   :  { %v489_v43 = vsel %vm278_vm8, %v478_v42, %v479_v36  ;;  %v1652_v47 = vpop.permute.xlu1 %387 }
  0xe0   :  { %v490_v44 = vsel %vm483_vm1, %v467_v38, %v489_v43  ;;  %v339_v46 = vpop.permute.xlu0 %338  ;;  %v398_v52 = vrot.slane %v1652_v47, 4 }
  0xe1   :  { %v347_v49 = vrot.slane %v339_v46, 4 }
  0xe3   :  { %v356_v50 = vsel %vm278_vm8, %v347_v49, %v348_v62  ;;  %v1659_v57 = vpop.permute.xlu1 %262 }
  0xe4   :  { %v357_v53 = vsel %vm351_vm3, %v339_v46, %v356_v50  ;;  %v386_v56 = vpop.permute.xlu0 %385  ;;  %v768_v60 = vld [vmem:[#allocation3 + $0x60] sm:$0xff]  ;;  %v273_v5 = vrot.slane %v1659_v57, 4 }
  0xe5   :  { %v397_v61 = vrot.slane %v386_v56, 4  ;;  %v1205_v1 = vcombine.high %v768_v60, %v490_v44  ;;  %v1204_v2 = vcombine.low %v768_v60, %v490_v44 }
  0xe7   :  { %v403_v4 = vsel %vm278_vm8, %v397_v61, %v398_v52  ;;  %1035 = vmatprep.subr.bf16.mxu0 %v1205_v1  ;;  %v1666_v9 = vpop.permute.xlu1 %268 }
  0xe8   :  { %v405_v7 = vsel %vm404_vm0, %v386_v56, %v403_v4  ;;  %v261_v8 = vpop.permute.xlu0 %260  ;;  %1036 = vmatpush1.bf16.msra.mxu0 %v1204_v2  ;;  %v276_v17 = vrot.slane %v1666_v9, 4 }
  0xe9   :  { %v272_v11 = vrot.slane %v261_v8, 4  ;;  %v1199_v12 = vcombine.high %v357_v53, %v405_v7  ;;  %v1198_v14 = vcombine.low %v357_v53, %v405_v7 }
  0xeb   :  { %v279_v16 = vsel %vm278_vm8, %v272_v11, %v273_v5  ;;  %1037 = vmatprep.subr.bf16.mxu0 %v1199_v12  ;;  %v1675_v23 = vpop.permute.xlu1 %334 }
  0xec   :  { %v1673_v18 = vsel %vm280_vm4, %v261_v8, %v279_v16  ;;  %v267_v19 = vpop.permute.xlu0 %266  ;;  %1038 = vmatpush1.bf16.msra.mxu0 %v1198_v14  ;;  %v345_v31 = vrot.slane %v1675_v23, 4 }
  0xed   :  { %v275_v24 = vrot.slane %v267_v19, 4 }
  0xef   :  { %v285_v27 = vsel %vm278_vm8, %v275_v24, %v276_v17  ;;  %v725_v37 = vpop.permute.xlu1 %724 }
  0xf0   :  { %v286_v32 = vsel %vm280_vm4, %v267_v19, %v285_v27  ;;  %v333_v35 = vpop.permute.xlu0 %332  ;;  %v731_v42 = vrot.slane %v725_v37, 4 }
  0xf1   :  { %302 = vst [vmem:[#allocation3 + $0x18] sm:$0x33] %v286_v32  ;;  %v344_v38 = vrot.slane %v333_v35, 4 }
  0xf2   :  { %v740_v44 = vsel %vm278_vm8, %v730_v6, %v731_v42  ;;  %v742_v46 = vsel %vm733_vm11, %v725_v37, %v731_v42 }
  0xf3   :  { %v350_v43 = vsel %vm278_vm8, %v344_v38, %v345_v31  ;;  %v741_v50 = vsel %vm733_vm11, %v1568_v15, %v740_v44  ;;  %754 = vst.msk [vmem:[#allocation3 + $0x148] sm:$0x33] %vm1452_vm2, %v742_v46  ;;  %v666_v56 = vpop.permute.xlu1 %665 }
  0xf4   :  { %v352_v49 = vsel %vm351_vm3, %v333_v35, %v350_v43  ;;  %v719_v53 = vpop.permute.xlu0 %718  ;;  %753 = vst [vmem:[#allocation3 + $0x140] sm:$0x33] %v741_v50  ;;  %v675_v61 = vrot.slane %v666_v56, 4  ;;  %v1738_v50 = vld [vmem:[#allocation4] sm:$0x3] }
  0xf5   :  { %367 = vst [vmem:[#allocation3 + $0x18] sm:$0xcc] %v352_v49  ;;  %v728_v60 = vrot.slane %v719_v53, 4 }
  0xf6   :  { %v682_v2 = vsel %vm278_vm8, %v674_v40, %v675_v61  ;;  %v684_v15 = vsel %vm680_vm14, %v666_v56, %v675_v61 }
  0xf7   :  { %v735_v6 = vsel %vm278_vm8, %v727_v28, %v728_v60  ;;  %v737_v1 = vsel %vm733_vm11, %v719_v53, %v728_v60  ;;  %v683_v7 = vsel %vm680_vm14, %v1592_v34, %v682_v2  ;;  %698 = vst.msk [vmem:[#allocation3 + $0x100] sm:$0xcc] %vm1462_vm5, %v684_v15  ;;  %v554_v8 = vpop.permute.xlu1 %553 }
  0xf8   :  { %v736_v4 = vsel %vm733_vm11, %v1582_v25, %v735_v6  ;;  %751 = vst.msk [vmem:[#allocation3 + $0x130] sm:$0xff] %vm1527_vm10, %v737_v1  ;;  %v607_v28 = vpop.permute.xlu0 %606  ;;  %697 = vst [vmem:[#allocation3 + $0xf8] sm:$0xcc] %v683_v7  ;;  %v560_v12 = vrot.slane %v554_v8, 4 }
  0xf9   :  { %v613_v11 = vrot.slane %v607_v28, 4 }
  0xfa   :  { %v569_v14 = vsel %vm278_vm8, %v559_v0, %v560_v12  ;;  %v571_v34 = vsel %vm562_vm15, %v554_v8, %v560_v12 }
  0xfb   :  { %v622_v40 = vsel %vm278_vm8, %v612_v22, %v613_v11  ;;  %v624_v25 = vsel %vm615_vm12, %v607_v28, %v613_v11  ;;  %v1724_v19 = vsel %vm562_vm15, %v1615_v58, %v569_v14  ;;  %583 = vst.msk [vmem:[#allocation3 + $0xd0] sm:$0xff] %vm1527_vm10, %v571_v34  ;;  %v548_v24 = vpop.permute.xlu1 %547  ;;  %v796_v32 = vld [vmem:[#allocation3 + $0x140] sm:$0x33] }
  0xfc   :  { %v623_v16 = vsel %vm615_vm12, %v1575_v20, %v622_v40  ;;  %636 = vst.msk [vmem:[#allocation3 + $0x100] sm:$0x33] %vm1452_vm2, %v624_v25  ;;  %v672_v22 = vpop.permute.xlu0 %671  ;;  %v759_v27 = vld [vmem:[#allocation3 + $0x18] sm:$0xff]  ;;  %v557_v35 = vrot.slane %v548_v24, 4  ;;  %v1231_v38 = vcombine.high %v736_v4, %v796_v32  ;;  %v1230_v42 = vcombine.low %v736_v4, %v796_v32 }
  0xfd   :  { %635 = vst [vmem:[#allocation3 + $0xf8] sm:$0x33] %v623_v16  ;;  %v678_v0 = vrot.slane %v672_v22, 4  ;;  %v1193_v37 = vcombine.high %v1673_v18, %v759_v27  ;;  %v1192_v20 = vcombine.low %v1673_v18, %v759_v27 }
  0xfe   :  { %v564_v44 = vsel %vm278_vm8, %v556_v48, %v557_v35  ;;  %v566_v46 = vsel %vm562_vm15, %v548_v24, %v557_v35  ;;  %1236 = vmatprep.subr.msk.bf16.mxu1 %vm1006_vm13, %v1231_v38  ;;  %v1014_v56 = vsel %vm1006_vm13, %v1230_v42, 0 }
  0xff   :  { %v687_v58 = vsel %vm278_vm8, %v677_v54, %v678_v0  ;;  %v689_v43 = vsel %vm680_vm14, %v672_v22, %v678_v0  ;;  %1039 = vmatprep.subr.bf16.mxu0 %v1193_v37  ;;  %v1270_v49 = vld [vmem:[#allocation3 + $0x134] ss:$24 sps:$4 sm:$0x3f]   ;;  %v565_v54 = vsel %vm562_vm15, %v1601_v45, %v564_v44  ;;  %580 = vst.msk [vmem:[#allocation3 + $0xb8] sm:$0xcc] %vm1462_vm5, %v566_v46  ;;  %v463_v53 = vpop.permute.xlu1 %462 }
 0x100   :  { %v688_v18 = vsel %vm680_vm14, %v1608_v51, %v687_v58  ;;  %701 = vst.msk [vmem:[#allocation3 + $0x118] sm:$0xff] %vm1527_vm10, %v689_v43  ;;  %1040 = vmatpush1.bf16.msra.mxu0 %v1192_v20  ;;  %v601_v48 = vpop.permute.xlu0 %600  ;;  %v1272_v60 = vld [vmem:[#allocation3 + $0x130] ss:$24 sps:$4 sm:$0x3f]   ;;  %579 = vst [vmem:[#allocation3 + $0xb0] sm:$0xcc] %v565_v54  ;;  %1069 = vmatpush1.bf16.msra.mxu1 %v1014_v56 }
 0x101   :  { %v610_v51 = vrot.slane %v601_v48, 4  ;;  %v476_v61 = vrot.slane %v463_v53, 4  ;;  %1238 = vmatprep.subr.msk.bf16.mxu0 %vm1006_vm13, %v1270_v49  ;;  %v1020_v2 = vsel %vm1006_vm13, %v1272_v60, 0 }
 0x103   :  { %v617_v45 = vsel %vm278_vm8, %v609_v30, %v610_v51  ;;  %v619_v6 = vsel %vm615_vm12, %v601_v48, %v610_v51  ;;  %v485_v1 = vsel %vm278_vm8, %v475_v21, %v476_v61  ;;  %1235 = vmatmul.mubr.msk.bf16.vlgmr.msra.gmra.mxu0 %vm1002_vm6, %v1738_v50  ;;  %v471_v7 = vpop.permute.xlu1 %470 }
 0x104   :  { %v618_v15 = vsel %vm615_vm12, %v1584_v26, %v617_v45  ;;  %633 = vst.msk [vmem:[#allocation3 + $0xe8] sm:$0xff] %vm1527_vm10, %v619_v6  ;;  %v486_v30 = vsel %vm483_vm1, %v1629_v13, %v485_v1  ;;  %1110 = vmatpush1.bf16.msra.mxu0 %v1020_v2  ;;  %v396_v4 = vpop.permute.xlu0 %395  ;;  %v787_v28 = vld [vmem:[#allocation3 + $0xf8] sm:$0xff]  ;;  %1139 = vmatprep.mubr.bf16.mxu0 %v1411_v55  ;;  %v480_v8 = vrot.slane %v471_v7, 4 }
 0x105   :  { %502 = vst [vmem:[#allocation3 + $0x68] sm:$0xcc] %v486_v30  ;;  %v402_v21 = vrot.slane %v396_v4, 4  ;;  %v1225_v11 = vcombine.high %v787_v28, %v688_v18  ;;  %v1224_v12 = vcombine.low %v787_v28, %v688_v18  ;;  %v1219_v55 = vcombine.high %v1724_v19, %v618_v15 }
 0x106   :  { %v491_v13 = vsel %vm278_vm8, %v479_v36, %v480_v8  ;;  %v1218_v32 = vcombine.low %v1724_v19, %v618_v15  ;;  %v1281_v44 = vld [vmem:[#allocation3 + $0xa4] ss:$24 sps:$4 sm:$0xff]  }
 0x107   :  { %v411_v26 = vsel %vm278_vm8, %v401_v10, %v402_v21  ;;  %v413_v40 = vsel %vm404_vm0, %v396_v4, %v402_v21  ;;  %v1273_v25 = vld [vmem:[#allocation3 + $0x100] ss:$24 sps:$4 sm:$0xff]   ;;  %v1275_v14 = vld [vmem:[#allocation3 + $0x104] ss:$24 sps:$4 sm:$0xff]   ;;  %1070 = vmatprep.subr.bf16.mxu1 %v1225_v11  ;;  %v492_v10 = vsel %vm483_vm1, %v1637_v29, %v491_v13  ;;  %v343_v22 = vpop.permute.xlu1 %342  ;;  %v778_v27 = vld [vmem:[#allocation3 + $0xb0] sm:$0xff] }
 0x108   :  { %v412_v34 = vsel %vm404_vm0, %v1622_v3, %v411_v26  ;;  %425 = vst.msk [vmem:[#allocation3 + $0x70] sm:$0x33] %vm1452_vm2, %v413_v40  ;;  %v465_v16 = vpop.permute.xlu0 %464  ;;  %1071 = vmatpush1.bf16.msra.mxu1 %v1224_v12  ;;  %v349_v36 = vrot.slane %v343_v22, 4  ;;  %1111 = vmatprep.subr.bf16.mxu0 %v1275_v14  ;;  %v1213_v3 = vcombine.high %v1474_v63, %v778_v27 }
 0x109   :  { %424 = vst [vmem:[#allocation3 + $0x68] sm:$0x33] %v412_v34  ;;  %v477_v24 = vrot.slane %v465_v16, 4  ;;  %1072 = vmatprep.subr.bf16.mxu1 %v1219_v55  ;;  %1112 = vmatpush1.bf16.msra.mxu0 %v1273_v25  ;;  %v1212_v46 = vcombine.low %v1474_v63, %v778_v27 }
 0x10a   :  { %v358_v29 = vsel %vm278_vm8, %v348_v62, %v349_v36  ;;  %v360_v35 = vsel %vm351_vm3, %v343_v22, %v349_v36 }
 0x10b   :  { %v487_v0 = vsel %vm278_vm8, %v476_v61, %v477_v24  ;;  %v1276_v37 = vld [vmem:[#allocation3 + $0xd0] ss:$24 sps:$4 sm:$0xff]   ;;  %v1278_v20 = vld [vmem:[#allocation3 + $0xd4] ss:$24 sps:$4 sm:$0xff]   ;;  %v359_v42 = vsel %vm351_vm3, %v1645_v39, %v358_v29  ;;  %372 = vst.msk [vmem:[#allocation3 + $0x40] sm:$0xff] %vm1527_vm10, %v360_v35  ;;  %v265_v58 = vpop.permute.xlu1 %264 }
 0x10c   :  { %v488_v38 = vsel %vm483_vm1, %v463_v53, %v487_v0  ;;  %v473_v19 = vpop.permute.xlu0 %472  ;;  %1073 = vmatpush1.bf16.msra.mxu1 %v1218_v32  ;;  %v274_v62 = vrot.slane %v265_v58, 4  ;;  %1113 = vmatprep.subr.bf16.mxu0 %v1278_v20  ;;  %v1279_v53 = vld [vmem:[#allocation3 + $0xa0] ss:$24 sps:$4 sm:$0xff]  }
 0x10d   :  { %503 = vst.msk [vmem:[#allocation3 + $0x70] sm:$0xcc] %vm1462_vm5, %v488_v38  ;;  %v481_v43 = vrot.slane %v473_v19, 4  ;;  %1074 = vmatprep.subr.bf16.mxu1 %v1213_v3  ;;  %1114 = vmatpush1.bf16.msra.mxu0 %v1276_v37 }
 0x10e   :  { %v282_v39 = vsel %vm278_vm8, %v273_v5, %v274_v62  ;;  %v284_v18 = vsel %vm280_vm4, %v265_v58, %v274_v62  ;;  %1115 = vmatprep.subr.bf16.mxu0 %v1281_v44 }
 0x10f   :  { %v493_v49 = vsel %vm278_vm8, %v480_v8, %v481_v43  ;;  %v283_v48 = vsel %vm280_vm4, %v1659_v57, %v282_v39  ;;  %301 = vst.msk [vmem:[#allocation3 + $0x10] sm:$0xff] %vm1527_vm10, %v284_v18  ;;  %v337_v63 = vpop.permute.xlu1 %336 }
 0x110   :  { %v494_v54 = vsel %vm483_vm1, %v471_v7, %v493_v49  ;;  %v390_v56 = vpop.permute.xlu0 %389  ;;  %1075 = vmatpush1.bf16.msra.mxu1 %v1212_v46  ;;  %v769_v60 = vld [vmem:[#allocation3 + $0x68] sm:$0xff]  ;;  %v346_v51 = vrot.slane %v337_v63, 4 }
 0x111   :  { %506 = vst.msk [vmem:[#allocation3 + $0x88] sm:$0xff] %vm1527_vm10, %v494_v54  ;;  %v399_v5 = vrot.slane %v390_v56, 4  ;;  %v1207_v61 = vcombine.high %v769_v60, %v492_v10  ;;  %v1206_v45 = vcombine.low %v769_v60, %v492_v10  ;;  %1116 = vmatpush1.bf16.msra.mxu0 %v1279_v53 }
 0x112   :  { %v353_v1 = vsel %vm278_vm8, %v345_v31, %v346_v51  ;;  %v355_v2 = vsel %vm351_vm3, %v337_v63, %v346_v51 }
 0x113   :  { %v406_v57 = vsel %vm278_vm8, %v398_v52, %v399_v5  ;;  %v408_v6 = vsel %vm404_vm0, %v390_v56, %v399_v5  ;;  %1076 = vmatprep.subr.bf16.mxu1 %v1207_v61  ;;  %v354_v30 = vsel %vm351_vm3, %v1675_v23, %v353_v1  ;;  %369 = vst.msk [vmem:[#allocation3 + $0x28] sm:$0xcc] %vm1462_vm5, %v355_v2 }
 0x114   :  { %v407_v15 = vsel %vm404_vm0, %v1652_v47, %v406_v57  ;;  %422 = vst.msk [vmem:[#allocation3 + $0x58] sm:$0xff] %vm1527_vm10, %v408_v6  ;;  %v271_v52 = vpop.permute.xlu0 %270  ;;  %1077 = vmatpush1.bf16.msra.mxu1 %v1206_v45  ;;  %368 = vst [vmem:[#allocation3 + $0x20] sm:$0xcc] %v354_v30 }
 0x115   :  { %v277_v4 = vrot.slane %v271_v52, 4  ;;  %v1201_v31 = vcombine.high %v359_v42, %v407_v15  ;;  %v1200_v7 = vcombine.low %v359_v42, %v407_v15 }
 0x117   :  { %v287_v28 = vsel %vm278_vm8, %v276_v17, %v277_v4  ;;  %v289_v47 = vsel %vm280_vm4, %v271_v52, %v277_v4  ;;  %1078 = vmatprep.subr.bf16.mxu1 %v1201_v31 }
 0x118   :  { %v288_v21 = vsel %vm280_vm4, %v1666_v9, %v287_v28  ;;  %304 = vst.msk [vmem:[#allocation3 + $0x28] sm:$0x33] %vm1452_vm2, %v289_v47  ;;  %v1282_v59 = vld [vmem:[#allocation3 + $0x70] ss:$24 sps:$4 sm:$0xff]   ;;  %v1284_v23 = vld [vmem:[#allocation3 + $0x74] ss:$24 sps:$4 sm:$0xff]   ;;  %1079 = vmatpush1.bf16.msra.mxu1 %v1200_v7 }
 0x119   :  { %303 = vst [vmem:[#allocation3 + $0x20] sm:$0x33] %v288_v21  ;;  %1117 = vmatprep.subr.bf16.mxu0 %v1284_v23 }
 0x11a   :  { %1118 = vmatpush1.bf16.msra.mxu0 %v1282_v59 }
 0x11b   :  { %v1287_v8 = vld [vmem:[#allocation3 + $0x44] ss:$24 sps:$4 sm:$0xff]   ;;  %v1285_v11 = vld [vmem:[#allocation3 + $0x40] ss:$24 sps:$4 sm:$0xff]  }
 0x11c   :  { %1119 = vmatprep.subr.bf16.mxu0 %v1287_v8 }
 0x11e   :  { %1120 = vmatpush1.bf16.msra.mxu0 %v1285_v11 }
 0x11f   :  { %v1290_v17 = vld [vmem:[#allocation3 + $0x14] ss:$24 sps:$4 sm:$0xff]   ;;  %v1288_v26 = vld [vmem:[#allocation3 + $0x10] ss:$24 sps:$4 sm:$0xff]  }
 0x120   :  { %v760_v12 = vld [vmem:[#allocation3 + $0x20] sm:$0xff]  ;;  %1121 = vmatprep.subr.bf16.mxu0 %v1290_v17 }
 0x121   :  { %v1195_v40 = vcombine.high %v283_v48, %v760_v12  ;;  %v1194_v13 = vcombine.low %v283_v48, %v760_v12 }
 0x122   :  { %1122 = vmatpush1.bf16.msra.mxu0 %v1288_v26 }
 0x123   :  { %1080 = vmatprep.subr.bf16.mxu1 %v1195_v40 }
 0x124   :  { %1081 = vmatpush1.bf16.msra.mxu1 %v1194_v13 }
 0x125   :  { %1239 = vmatmul.mubr.msk.bf16.vlgmr.msra.gmra.mxu0 %vm1002_vm6, %v1738_v50 }
 0x127   :  { %1237 = vmatmul.mubr.msk.bf16.vlgmr.msra.gmra.mxu1 %vm1002_vm6, %v1738_v50 }
 0x1c3   :  { %v1059_v33 = vpop.f32.mrf.mxu0 }
 0x1c5   :  { %v1061_v9 = vpop.f32.mrf.mxu0 }
 0x1c6   :  { %v1154_v25 = vcombine.low %v1059_v33, %v1061_v9 }
 0x1c7   :  { %v1063_v14 = vpop.f32.mrf.mxu0 }
 0x1c8   :  { %1160 = vst [vmem:[#allocation12] sm:$0xff] %v1154_v25 }
 0x1c9   :  { %v1064_v55 = vpop.f32.mrf.mxu0 }
 0x1e5   :  { %v1141_v34 = vpop.f32.mrf.mxu0 }
 0x1e7   :  { %v1100_v10 = vpop.f32.mrf.mxu1  ;;  %v1143_v16 = vpop.f32.mrf.mxu0 }
 0x1e8   :  { %v1156_v24 = vcombine.low %v1141_v34, %v1143_v16 }
 0x1e9   :  { %v1102_v22 = vpop.f32.mrf.mxu1  ;;  %v1145_v27 = vpop.f32.mrf.mxu0 }
 0x1ea   :  { %v1155_v36 = vcombine.low %v1100_v10, %v1102_v22  ;;  %1162 = vst.msk [vmem:[#allocation12 + $0x10] sm:$0xff] %vm1527_vm10, %v1156_v24 }
 0x1eb   :  { %v1104_v50 = vpop.f32.mrf.mxu1  ;;  %v1146_v32 = vpop.f32.mrf.mxu0 }
 0x1ec   :  { %1161 = vst [vmem:[#allocation12 + $0x8] sm:$0xff] %v1155_v36 }
 0x1ed   :  { %v1105_v3 = vpop.f32.mrf.mxu1 }
 0x1ee   :  { %1382 = shalt.err (!%p1379_p10)
}
 0x1ef   :  { %1172 = dma.vmem_to_hbm [thread:$0]  %s1170_s14, 384, %s1846_s4, [#allocation6]  }
 0x1f0   :  { %1397 = dma.done.wait [#allocation6], 384  }
 0x1f1   :  { %1398 = vsyncadd [#allocation6], 4294966912 }
 0x1f2   :  { %1176 = vsyncpa [#allocation5], 1 }
 0x1f3   :  { %1177 = vsyncpa [#allocation8], 1 }
 0x1f4   :  { %1178 = vsyncpa [#allocation11], 1 }
 0x1f5   :  { %1179 = vsyncpa [#allocation6], 1 }

</bundles_post_ra>
